<compile_context>
chip_gen: v6e
topology: v6e:2x2x1
jax: 0.10.0
libtpu: 0.0.40
codegen_flags: <defaults>
</compile_context>

<pallas_src>
import jax
import jax.numpy as jnp
from jax.experimental import pallas as pl
from jax.experimental.pallas import tpu as pltpu


def _round_up(v, m):
    return ((v + m - 1) // m) * m


def _dqn_mlp_kernel(x_ref, w1_ref, b1_ref, w2_ref, b2_ref, o_ref):
    # Fused MLP on one batch tile (all f32, f32 accumulation):
    #   (TB, n_state) @ (n_state, hidden) + b1 -> ReLU
    #   -> (TB, hidden) @ (hidden, n_action) + b2
    x = x_ref[...]
    h = jnp.dot(x, w1_ref[...], preferred_element_type=jnp.float32)
    h = jnp.maximum(h + b1_ref[...], 0.0)
    out = jnp.dot(h, w2_ref[...], preferred_element_type=jnp.float32)
    o_ref[...] = (out + b2_ref[...]).astype(o_ref.dtype)


def _pick_tb(batch, block_b):
    """Batch-tile size: multiple of 8, capped for VMEM, and split into >=2
    roughly balanced tiles for moderate batches (v7x megacore)."""
    if batch <= 8:
        return batch                       # single tile, block == full batch dim
    cap = max(8, (min(block_b, 8192) // 8) * 8)
    if batch <= 2 * cap:
        return min(cap, _round_up((batch + 1) // 2, 8))
    return cap


def dqn_forward(x, w1, b1, w2, b2, *, block_b=4096, min_pallas_batch=0):
    """x: (B, n_state); w1: (n_state, hidden); b1: (1, hidden);
    w2: (hidden, n_action); b2: (1, n_action) -> (B, n_action) f32.

    Weights are stored (in_features, out_features) so the kernel computes
    x @ W + b, equivalent to PyTorch's x @ W.T with W of shape (out, in).
    """
    B, n_state = x.shape
    hidden = w1.shape[1]
    n_action = w2.shape[1]

    if B < min_pallas_batch:
        # Tiny online-inference batches: fixed launch/DMA overhead dominates;
        # a fused XLA matmul pair is as fast. Off by default (threshold 0).
        return jnp.maximum(x @ w1 + b1, 0.0) @ w2 + b2

    tb = _pick_tb(B, block_b)
    grid = (pl.cdiv(B, tb),)

    # Advisory cost hint: two tiny matmuls, traffic dominated by x and out.
    flops = 2 * B * (n_state * hidden + hidden * n_action)
    bytes_accessed = 4 * (B * n_state + B * n_action
                          + n_state * hidden + hidden
                          + hidden * n_action + n_action)
    cost = pl.CostEstimate(flops=flops, transcendentals=0,
                           bytes_accessed=bytes_accessed)

    return pl.pallas_call(
        _dqn_mlp_kernel,
        out_shape=jax.ShapeDtypeStruct((B, n_action), jnp.float32),
        grid=grid,
        in_specs=[
            # streamed batch tile (last dim = full n_state, rows multiple of 8)
            pl.BlockSpec((tb, n_state), lambda i: (i, 0)),
            # VMEM-resident params: full-array blocks, constant block index
            pl.BlockSpec((n_state, hidden), lambda i: (0, 0)),
            pl.BlockSpec((1, hidden), lambda i: (0, 0)),
            pl.BlockSpec((hidden, n_action), lambda i: (0, 0)),
            pl.BlockSpec((1, n_action), lambda i: (0, 0)),
        ],
        # unpadded output: (tb, n_action) block, n_action = full array dim
        out_specs=pl.BlockSpec((tb, n_action), lambda i: (i, 0)),
        compiler_params=pltpu.CompilerParams(
            dimension_semantics=("parallel",)),   # megacore sharding on v7x
        cost_estimate=cost,
    )(x, w1, b1, w2, b2)


def init_params(key, n_state, hidden, n_action):
    """Deterministic synthetic init mirroring the PyTorch module:
    weights ~ N(0, 0.1); biases use PyTorch's default Linear init
    (uniform in +/- 1/sqrt(fan_in))."""
    k1, k2, k3, k4 = jax.random.split(key, 4)
    w1 = jax.random.normal(k1, (n_state, hidden), jnp.float32) * 0.1
    b1 = jax.random.uniform(k2, (1, hidden), jnp.float32,
                            minval=-1.0 / jnp.sqrt(n_state),
                            maxval=1.0 / jnp.sqrt(n_state))
    w2 = jax.random.normal(k3, (hidden, n_action), jnp.float32) * 0.1
    b2 = jax.random.uniform(k4, (1, n_action), jnp.float32,
                            minval=-1.0 / jnp.sqrt(hidden),
                            maxval=1.0 / jnp.sqrt(hidden))
    return w1, b1, w2, b2


if __name__ == "__main__":
    # Small shapes consistent with the module: env-determined n_state / n_action.
    batch, n_state, hidden, n_action = 2, 16, 32, 8

    key = jax.random.PRNGKey(0)
    kx, kp = jax.random.split(key)
    x = jax.random.normal(kx, (batch, n_state), jnp.float32)
    w1, b1, w2, b2 = init_params(kp, n_state, hidden, n_action)

    out = dqn_forward(x, w1, b1, w2, b2)
    jax.block_until_ready(out)

    ref = jnp.maximum(x @ w1 + b1, 0.0) @ w2 + b2
    assert out.shape == (batch, n_action)
    assert jnp.allclose(out, ref, atol=1e-5, rtol=1e-5)

    # Replay-buffer sized batch: exercises >=2 balanced grid steps (megacore),
    # VMEM-resident weights across steps, and a partial last batch tile.
    big_b = 1000
    xb = jax.random.normal(jax.random.PRNGKey(1), (big_b, n_state), jnp.float32)
    outb = dqn_forward(xb, w1, b1, w2, b2)
    jax.block_until_ready(outb)
    refb = jnp.maximum(xb @ w1 + b1, 0.0) @ w2 + b2
    assert outb.shape == (big_b, n_action)
    assert jnp.allclose(outb, refb, atol=1e-4, rtol=1e-4)

    # Very large batch: multiple full 4096-row tiles.
    huge_b = 12000
    xh = jax.random.normal(jax.random.PRNGKey(2), (huge_b, n_state), jnp.float32)
    outh = dqn_forward(xh, w1, b1, w2, b2)
    jax.block_until_ready(outh)
    refh = jnp.maximum(xh @ w1 + b1, 0.0) @ w2 + b2
    assert outh.shape == (huge_b, n_action)
    assert jnp.allclose(outh, refh, atol=1e-4, rtol=1e-4)

    print("KERNEL_OK")
</pallas_src>

<mosaic_0001>
module attributes {stable_mosaic.version = 11 : i64} {
  func.func @_dqn_mlp_kernel(%arg0: i32, %arg1: memref<2x16xf32, #tpu.memory_space<vmem>>, %arg2: memref<16x32xf32, #tpu.memory_space<vmem>>, %arg3: memref<1x32xf32, #tpu.memory_space<vmem>>, %arg4: memref<32x8xf32, #tpu.memory_space<vmem>>, %arg5: memref<1x8xf32, #tpu.memory_space<vmem>>, %arg6: memref<2x8xf32, #tpu.memory_space<vmem>>) attributes {dimension_semantics = [#tpu.dimension_semantics<parallel>], iteration_bounds = array<i64: 1>, scalar_prefetch = 0 : i64, scratch_operands = 0 : i64, tpu.core_type = #tpu.core_type<tc>, window_params = [{transform_indices = @transform_0, window_bounds = array<i64: 2, 16>}, {pipeline_mode = #tpu.pipeline_mode<synchronous>, transform_indices = @transform_1, window_bounds = array<i64: 16, 32>}, {pipeline_mode = #tpu.pipeline_mode<synchronous>, transform_indices = @transform_2, window_bounds = array<i64: 1, 32>}, {pipeline_mode = #tpu.pipeline_mode<synchronous>, transform_indices = @transform_3, window_bounds = array<i64: 32, 8>}, {pipeline_mode = #tpu.pipeline_mode<synchronous>, transform_indices = @transform_4, window_bounds = array<i64: 1, 8>}, {transform_indices = @transform_5, window_bounds = array<i64: 2, 8>}]} {
    %c0 = arith.constant 0 : index
    %c0_0 = arith.constant 0 : index
    %0 = vector.load %arg1[%c0, %c0_0] : memref<2x16xf32, #tpu.memory_space<vmem>>, vector<2x16xf32>
    %c0_1 = arith.constant 0 : index
    %c0_2 = arith.constant 0 : index
    %1 = vector.load %arg2[%c0_1, %c0_2] : memref<16x32xf32, #tpu.memory_space<vmem>>, vector<16x32xf32>
    %cst = arith.constant dense<0.000000e+00> : vector<2x32xf32>
    %2 = tpu.matmul %0, %1, %cst {dimension_numbers = #tpu.dot_dimension_numbers<[1], [0], [0], [1], [0, 0, 1, 1], [], []>} : vector<2x16xf32>, vector<16x32xf32>, vector<2x32xf32> -> vector<2x32xf32>
    %c0_3 = arith.constant 0 : index
    %c0_4 = arith.constant 0 : index
    %3 = vector.load %arg3[%c0_3, %c0_4] : memref<1x32xf32, #tpu.memory_space<vmem>>, vector<1x32xf32>
    %4 = vector.broadcast %3 : vector<1x32xf32> to vector<2x32xf32>
    %5 = arith.addf %2, %4 : vector<2x32xf32>
    %cst_5 = arith.constant 0.000000e+00 : f32
    %6 = vector.broadcast %cst_5 : f32 to vector<2x32xf32>
    %7 = arith.maximumf %5, %6 : vector<2x32xf32>
    %c0_6 = arith.constant 0 : index
    %c0_7 = arith.constant 0 : index
    %8 = vector.load %arg4[%c0_6, %c0_7] : memref<32x8xf32, #tpu.memory_space<vmem>>, vector<32x8xf32>
    %cst_8 = arith.constant dense<0.000000e+00> : vector<2x8xf32>
    %9 = tpu.matmul %7, %8, %cst_8 {dimension_numbers = #tpu.dot_dimension_numbers<[1], [0], [0], [1], [0, 0, 1, 1], [], []>} : vector<2x32xf32>, vector<32x8xf32>, vector<2x8xf32> -> vector<2x8xf32>
    %c0_9 = arith.constant 0 : index
    %c0_10 = arith.constant 0 : index
    %10 = vector.load %arg5[%c0_9, %c0_10] : memref<1x8xf32, #tpu.memory_space<vmem>>, vector<1x8xf32>
    %11 = vector.broadcast %10 : vector<1x8xf32> to vector<2x8xf32>
    %12 = arith.addf %9, %11 : vector<2x8xf32>
    %c0_11 = arith.constant 0 : index
    %c0_12 = arith.constant 0 : index
    %13 = vector.load %arg6[%c0_11, %c0_12] : memref<2x8xf32, #tpu.memory_space<vmem>>, vector<2x8xf32>
    tpu.vector_store %arg6[%c0_11, %c0_12], %12 {strides = array<i32>} : memref<2x8xf32, #tpu.memory_space<vmem>>, vector<2x8xf32>,
    return
  }
  func.func @transform_0(%arg0: i32) -> (i32, i32) {
    %c0_i32 = arith.constant 0 : i32
    %c0_i32_0 = arith.constant 0 : i32
    return %arg0, %c0_i32 : i32, i32
  }
  func.func @transform_1(%arg0: i32) -> (i32, i32) {
    %c0_i32 = arith.constant 0 : i32
    %c0_i32_0 = arith.constant 0 : i32
    %c0_i32_1 = arith.constant 0 : i32
    return %c0_i32, %c0_i32_0 : i32, i32
  }
  func.func @transform_2(%arg0: i32) -> (i32, i32) {
    %c0_i32 = arith.constant 0 : i32
    %c0_i32_0 = arith.constant 0 : i32
    %c0_i32_1 = arith.constant 0 : i32
    return %c0_i32, %c0_i32_0 : i32, i32
  }
  func.func @transform_3(%arg0: i32) -> (i32, i32) {
    %c0_i32 = arith.constant 0 : i32
    %c0_i32_0 = arith.constant 0 : i32
    %c0_i32_1 = arith.constant 0 : i32
    return %c0_i32, %c0_i32_0 : i32, i32
  }
  func.func @transform_4(%arg0: i32) -> (i32, i32) {
    %c0_i32 = arith.constant 0 : i32
    %c0_i32_0 = arith.constant 0 : i32
    %c0_i32_1 = arith.constant 0 : i32
    return %c0_i32, %c0_i32_0 : i32, i32
  }
  func.func @transform_5(%arg0: i32) -> (i32, i32) {
    %c0_i32 = arith.constant 0 : i32
    %c0_i32_0 = arith.constant 0 : i32
    return %arg0, %c0_i32 : i32, i32
  }
}

</mosaic_0001>

<bundles_post_ra>
// kernel: tpu_custom_call.1
= control target key start
LH: loop header
LB: loop body
LE: loop exit
PB: predicated region body
PF: predicated region fallthrough
CT: control target
= control target key end

     0   :  { %v262_v1 = vmov 0.0   ;;  %vm263_vm0 = vmmov 0   ;;  %s325_s0 = inlined_call_operand.vmem [shape: f32[2,16], index: 0, kind: input, shape index: {}]   ;;  %s326_s1 = inlined_call_operand.vmem [shape: f32[16,32], index: 1, kind: input, shape index: {}]   ;;  %s327_s2 = inlined_call_operand.vmem [shape: f32[1,32], index: 2, kind: input, shape index: {}]   ;;  %s328_s3 = inlined_call_operand.vmem [shape: f32[32,8], index: 3, kind: input, shape index: {}]   ;;  %s329_s4 = inlined_call_operand.vmem [shape: f32[1,8], index: 4, kind: input, shape index: {}]   ;;  %s330_s5 = inlined_call_operand.hbm [shape: f32[2,8], index: 5, kind: output, shape index: {}]  }
   0x1   :  { %v23_v0 = vld [vmem:[%s326_s1 + $0x8] sm:$0xff]  ;;  %219 = vmatprep.subr.mxu0 %v262_v1  ;;  %v22_v2 = vld [vmem:[%s326_s1] sm:$0xff]  ;;  %223 = vmatprep.mubr.msk.f32.mxu0 %vm263_vm0, %v262_v1  ;;  %v109_v3 = vld [vmem:[%s328_s3 + $0x18] sm:$0xff] }
   0x2   :  { %10 = vsyncpa [#allocation3], 0  ;;  %220 = vmatpush3.msra.mxu0 %v23_v0  ;;  %v21_v4 = vld [vmem:[%s325_s0] sm:$0x3]  ;;  %vm31_vm1 = vcmask 130048   ;;  %226 = vmatprep.subr.mxu1 %v262_v1  ;;  %v108_v5 = vld [vmem:[%s328_s3 + $0x10] sm:$0xff] }
   0x3   :  { %221 = vmatprep.subr.mxu0 %v262_v1  ;;  %227 = vmatpush3.msra.mxu1 %v109_v3  ;;  %v107_v6 = vld [vmem:[%s328_s3 + $0x8] sm:$0xff]  ;;  %v106_v7 = vld [vmem:[%s328_s3] sm:$0xff]  ;;  %vm117_vm2 = vcmask 261120   ;;  %s264_s9 = smov [#allocation2]   ;;  %vm191_vm3 = vcmask 58368  }
   0x4   :  { %222 = vmatpush3.msra.mxu0 %v22_v2  ;;  %228 = vmatprep.subr.mxu1 %v262_v1  ;;  %v207_v8 = vld [vmem:[%s327_s2] ss:$0 sm:$0xff]  ;;  %s199_s10 = sshll.u32 %s264_s9, 4  ;;  %s200_s10 = int_to_ptr.vmem [resolvable:$true] %s199_s10 }
   0x5   :  { %224 = vmatmul.mubr.msk.f32.vlgmr.msra.gmra.mxu0 %vm31_vm1, %v21_v4  ;;  %234 = vmatprep.mubr.msk.f32.mxu1 %vm263_vm0, %v262_v1  ;;  %v209_v13 = vld [vmem:[%s329_s4] ss:$0 sm:$0xff]  ;;  %s240_s3 = scalar_lea.vmem %s200_s10, 32  ;;  %p245_p1 = scmp.lt.s32.totalorder %s200_s10, %s200_s10 }
   0x6   :  { %229 = vmatpush3.msra.mxu1 %v108_v5  ;;  %p241_p0 = scmp.ne.s32.totalorder %s200_s10, %s240_s3  ;;  %p246_p2 = scmp.lt.s32.totalorder %s240_s3, %s240_s3 }
   0x7   :  { %230 = vmatprep.subr.mxu1 %v262_v1 }
   0x8   :  { %231 = vmatpush3.msra.mxu1 %v107_v6  ;;  %p247_p3 = por %p246_p2, %p245_p1 }
   0x9   :  { %232 = vmatprep.subr.mxu1 %v262_v1 }
   0xa   :  { %233 = vmatpush3.msra.mxu1 %v106_v7  ;;  %p248_p4 = pnand %p247_p3, %p241_p0 }
  0xc5   :  { %v101_v9 = vpop.f32.mrf.mxu0 }
  0xc6   :  { %v102_v10 = vadd.f32 %v207_v8, %v101_v9 }
  0xc7   :  { %v225_v11 = vpop.f32.mrf.mxu0 }
  0xc8   :  { %v105_v12 = vmax.f32 %v102_v10, 0.0 }
  0xca   :  { %235 = vmatmul.mubr.msk.f32.vlgmr.msra.gmra.mxu1 %vm117_vm2, %v105_v12 }
 0x18a   :  { %v187_v14 = vpop.f32.mrf.mxu1 }
 0x18b   :  { %v188_v15 = vadd.f32 %v209_v13, %v187_v14 }
 0x18c   :  { %v236_v16 = vpop.f32.mrf.mxu1 }
 0x18d   :  { %192 = vst.msk [vmem:[#allocation2] sm:$0x3] %vm191_vm3, %v188_v15 }
 0x18e   :  { %251 = shalt.err (!%p248_p4)
}
 0x18f   :  { %202 = dma.vmem_to_hbm [thread:$0]  %s200_s10, 32, %s330_s5, [#allocation3]  }
 0x190   :  { %260 = dma.done.wait [#allocation3], 32  }
 0x191   :  { %261 = vsyncadd [#allocation3], 4294967264 }
 0x192   :  { %206 = vsyncpa [#allocation3], 1 }

</bundles_post_ra>
